<compile_context>
chip_gen: v7x
topology: tpu7x:2x2x1
jax: 0.10.0
libtpu: 0.0.40
codegen_flags: <defaults>
</compile_context>

<pallas_src>
import jax
import jax.numpy as jnp
import numpy as np
from jax.experimental import pallas as pl
from jax.experimental.pallas import tpu as pltpu


IN_F = 41      # input features
HID_F = 82     # hidden features
OUT_F = 10     # output features

LANES = 128    # padded feature width (one lane group)
TM = 128       # batch rows per grid step
SLAB_ROWS = 392  # 3 * 128 weight rows + 8 rows of biases / padding

# Lane layout of the first (augmented) matmul output:
#   lanes [0, 10)   : 0.01 * s @ W3   (pre-folded skip contribution)
#   lanes [10, 92)  : h1 = x @ W1 + b1
#   lanes [92, 128) : zero
S_OFF = 0
H1_OFF = 10


def storage_auth_kernel(x_ref, slab_ref, o_ref):
    x = x_ref[...]                       # (TM, 128), cols >= 41 are zero

    w1 = slab_ref[0:128, :]              # augmented input-layer weight
    w2 = slab_ref[128:256, :]            # hidden-layer weight (rows shifted by 10)
    w3 = slab_ref[256:384, :]            # output-layer weight (cols 0..9)
    b1 = slab_ref[384:385, :]
    b2 = slab_ref[385:386, :]
    b3 = slab_ref[386:387, :]

    # matmul 1: h1 (lanes 10..91) and 0.01*s@W3 (lanes 0..9) in one MXU pass.
    first = jnp.dot(x, w1, preferred_element_type=jnp.float32) + b1

    # relu then abs(Threshold(-1.0001, 0)(-r))  ==  r where r < 1.0001 else 0.
    r = jnp.maximum(first, 0.0)
    act = jnp.where(r < 1.0001, r, 0.0)

    # matmul 2: hidden layer.  Weight rows 0..9 and 92..127 are zero, so the
    # non-h1 lanes of `act` contribute nothing.
    h2 = jnp.dot(act, w2, preferred_element_type=jnp.float32) + b2
    h2 = jnp.where(h2 > 40.0, h2, 0.0)   # Threshold(40, 0)

    # matmul 3: output layer.  Adding `first` injects the folded 0.01*s@W3
    # term on lanes 0..9; lanes >= 10 of the output are junk (sliced outside).
    out = jnp.dot(h2, w3, preferred_element_type=jnp.float32) + first + b3
    o_ref[...] = out


def init_params(key):
    """Deterministic PyTorch-Linear-style init (uniform +-1/sqrt(fan_in)).
    Weights stored as (in, out), biases as (out,)."""
    ks = jax.random.split(key, 6)

    def linear(kw, kb, fan_in, fan_out):
        bound = 1.0 / float(np.sqrt(fan_in))
        w = jax.random.uniform(kw, (fan_in, fan_out), jnp.float32, -bound, bound)
        b = jax.random.uniform(kb, (fan_out,), jnp.float32, -bound, bound)
        return w, b

    w1, b1 = linear(ks[0], ks[1], IN_F, HID_F)
    w2, b2 = linear(ks[2], ks[3], HID_F, HID_F)
    w3, b3 = linear(ks[4], ks[5], HID_F, OUT_F)
    return w1, b1, w2, b2, w3, b3


def pack_params(params):
    """Fold the static gather into the weights and pack all parameters into a
    single zero-padded (SLAB_ROWS, 128) f32 slab.  Built once on the host."""
    w1, b1, w2, b2, w3, b3 = (np.asarray(p, np.float32) for p in params)

    # Sel[i, j] = 1 iff s[j] == h1[i], for s = cat(zeros(1), h1[41:], h1[41:-1])
    sel = np.zeros((HID_F, HID_F), np.float32)
    sel[np.arange(IN_F, HID_F), np.arange(1, IN_F + 1)] = 1.0        # s[1:42]
    sel[np.arange(IN_F, HID_F - 1), np.arange(IN_F + 1, HID_F)] = 1.0  # s[42:82]

    w3s = 0.01 * sel @ w3            # (82, 10):  0.01 * s @ W3 == h1 @ w3s

    w1_big = np.zeros((LANES, LANES), np.float32)
    w1_big[:IN_F, S_OFF:S_OFF + OUT_F] = w1 @ w3s        # x @ (W1 @ w3s)
    w1_big[:IN_F, H1_OFF:H1_OFF + HID_F] = w1            # x @ W1

    b1_big = np.zeros((LANES,), np.float32)
    b1_big[S_OFF:S_OFF + OUT_F] = b1 @ w3s
    b1_big[H1_OFF:H1_OFF + HID_F] = b1

    w2_big = np.zeros((LANES, LANES), np.float32)
    w2_big[H1_OFF:H1_OFF + HID_F, :HID_F] = w2

    b2_big = np.zeros((LANES,), np.float32)
    b2_big[:HID_F] = b2

    w3_big = np.zeros((LANES, LANES), np.float32)
    w3_big[:HID_F, :OUT_F] = w3

    b3_big = np.zeros((LANES,), np.float32)
    b3_big[:OUT_F] = b3

    slab = np.zeros((SLAB_ROWS, LANES), np.float32)
    slab[0:128] = w1_big
    slab[128:256] = w2_big
    slab[256:384] = w3_big
    slab[384] = b1_big
    slab[385] = b2_big
    slab[386] = b3_big
    return jnp.asarray(slab)


@jax.jit
def storage_auth_forward(x, slab):
    """Batched forward: x is (B, 41) or (41,); returns (B, 10) or (10,)."""
    squeeze = x.ndim == 1
    if squeeze:
        x = x[None, :]
    x = x.astype(jnp.float32)

    b = x.shape[0]
    b_pad = ((b + TM - 1) // TM) * TM
    xp = jnp.zeros((b_pad, LANES), jnp.float32).at[:b, :IN_F].set(x)

    out = pl.pallas_call(
        storage_auth_kernel,
        out_shape=jax.ShapeDtypeStruct((b_pad, LANES), jnp.float32),
        grid=(b_pad // TM,),
        in_specs=[
            pl.BlockSpec((TM, LANES), lambda i: (i, 0)),          # x tile
            pl.BlockSpec((SLAB_ROWS, LANES), lambda i: (0, 0)),   # resident weights
        ],
        out_specs=pl.BlockSpec((TM, LANES), lambda i: (i, 0)),
        compiler_params=pltpu.CompilerParams(
            dimension_semantics=("parallel",)),
    )(xp, slab)

    out = out[:b, :OUT_F]
    return out[0] if squeeze else out


def reference_forward(x, params):
    """Pure-JAX reference mirroring the PyTorch forward, applied row-wise."""
    w1, b1, w2, b2, w3, b3 = params
    x = jnp.atleast_2d(x).astype(jnp.float32)
    h1 = x @ w1 + b1
    s = jnp.concatenate(
        [jnp.zeros((x.shape[0], 1), jnp.float32), h1[:, IN_F:], h1[:, IN_F:-1]],
        axis=1)
    r = jnp.maximum(h1, 0.0)
    x2 = jnp.abs(jnp.where(-r > -1.0001, -r, 0.0))
    h2 = x2 @ w2 + b2
    h2 = jnp.where(h2 > 40.0, h2, 0.0)
    h2 = h2 + 0.01 * s
    return h2 @ w3 + b3


if __name__ == "__main__":
    key = jax.random.PRNGKey(0)
    k_x, k_p = jax.random.split(key)

    B = 256                                    # 2 grid steps of TM=128 rows
    x = jax.random.normal(k_x, (B, IN_F), dtype=jnp.float32)
    params = init_params(k_p)
    slab = pack_params(params)                 # packed once, reused every call

    out = storage_auth_forward(x, slab)
    out = jax.block_until_ready(out)

    ref = reference_forward(x, params)
    assert out.shape == (B, OUT_F), out.shape
    assert jnp.allclose(out, ref, atol=1e-4, rtol=1e-4), (
        float(jnp.max(jnp.abs(out - ref))))

    # Single-sample path (matches the original module's 1-D signature).
    out1 = jax.block_until_ready(storage_auth_forward(x[0], slab))
    assert out1.shape == (OUT_F,)
    assert jnp.allclose(out1, ref[0], atol=1e-4, rtol=1e-4)

    print("KERNEL_OK")
</pallas_src>

<mosaic_0001>
module attributes {stable_mosaic.version = 11 : i64} {
  func.func @storage_auth_kernel(%arg0: i32, %arg1: memref<128x128xf32, #tpu.memory_space<vmem>>, %arg2: memref<392x128xf32, #tpu.memory_space<vmem>>, %arg3: memref<128x128xf32, #tpu.memory_space<vmem>>) attributes {dimension_semantics = [#tpu.dimension_semantics<parallel>], iteration_bounds = array<i64: 2>, scalar_prefetch = 0 : i64, scratch_operands = 0 : i64, tpu.core_type = #tpu.core_type<tc>, window_params = [{transform_indices = @transform_0, window_bounds = array<i64: 128, 128>}, {pipeline_mode = #tpu.pipeline_mode<synchronous>, transform_indices = @transform_1, window_bounds = array<i64: 392, 128>}, {transform_indices = @transform_2, window_bounds = array<i64: 128, 128>}]} {
    %c0 = arith.constant 0 : index
    %c0_0 = arith.constant 0 : index
    %0 = vector.load %arg1[%c0, %c0_0] : memref<128x128xf32, #tpu.memory_space<vmem>>, vector<128x128xf32>
    %c0_1 = arith.constant 0 : index
    %c0_2 = arith.constant 0 : index
    %1 = vector.load %arg2[%c0_1, %c0_2] : memref<392x128xf32, #tpu.memory_space<vmem>>, vector<128x128xf32>
    %c128 = arith.constant 128 : index
    %c0_3 = arith.constant 0 : index
    %2 = vector.load %arg2[%c128, %c0_3] : memref<392x128xf32, #tpu.memory_space<vmem>>, vector<128x128xf32>
    %c256 = arith.constant 256 : index
    %c0_4 = arith.constant 0 : index
    %3 = vector.load %arg2[%c256, %c0_4] : memref<392x128xf32, #tpu.memory_space<vmem>>, vector<128x128xf32>
    %c384 = arith.constant 384 : index
    %c0_5 = arith.constant 0 : index
    %4 = vector.load %arg2[%c384, %c0_5] : memref<392x128xf32, #tpu.memory_space<vmem>>, vector<1x128xf32>
    %c385 = arith.constant 385 : index
    %c0_6 = arith.constant 0 : index
    %5 = vector.load %arg2[%c385, %c0_6] : memref<392x128xf32, #tpu.memory_space<vmem>>, vector<1x128xf32>
    %c386 = arith.constant 386 : index
    %c0_7 = arith.constant 0 : index
    %6 = vector.load %arg2[%c386, %c0_7] : memref<392x128xf32, #tpu.memory_space<vmem>>, vector<1x128xf32>
    %cst = arith.constant dense<0.000000e+00> : vector<128x128xf32>
    %7 = tpu.matmul %0, %1, %cst {dimension_numbers = #tpu.dot_dimension_numbers<[1], [0], [0], [1], [0, 0, 1, 1], [], []>} : vector<128x128xf32>, vector<128x128xf32>, vector<128x128xf32> -> vector<128x128xf32>
    %8 = vector.broadcast %4 : vector<1x128xf32> to vector<128x128xf32>
    %9 = arith.addf %7, %8 : vector<128x128xf32>
    %cst_8 = arith.constant 0.000000e+00 : f32
    %10 = vector.broadcast %cst_8 : f32 to vector<128x128xf32>
    %11 = arith.maximumf %9, %10 : vector<128x128xf32>
    %cst_9 = arith.constant 1.000100e+00 : f32
    %12 = vector.broadcast %cst_9 : f32 to vector<128x128xf32>
    %13 = arith.cmpf olt, %11, %12 : vector<128x128xf32>
    %cst_10 = arith.constant 0.000000e+00 : f32
    %14 = vector.broadcast %cst_10 : f32 to vector<128x128xf32>
    %15 = arith.select %13, %11, %14 : vector<128x128xi1>, vector<128x128xf32>
    %cst_11 = arith.constant dense<0.000000e+00> : vector<128x128xf32>
    %16 = tpu.matmul %15, %2, %cst_11 {dimension_numbers = #tpu.dot_dimension_numbers<[1], [0], [0], [1], [0, 0, 1, 1], [], []>} : vector<128x128xf32>, vector<128x128xf32>, vector<128x128xf32> -> vector<128x128xf32>
    %17 = vector.broadcast %5 : vector<1x128xf32> to vector<128x128xf32>
    %18 = arith.addf %16, %17 : vector<128x128xf32>
    %cst_12 = arith.constant 4.000000e+01 : f32
    %19 = vector.broadcast %cst_12 : f32 to vector<128x128xf32>
    %20 = arith.cmpf ogt, %18, %19 : vector<128x128xf32>
    %cst_13 = arith.constant 0.000000e+00 : f32
    %21 = vector.broadcast %cst_13 : f32 to vector<128x128xf32>
    %22 = arith.select %20, %18, %21 : vector<128x128xi1>, vector<128x128xf32>
    %cst_14 = arith.constant dense<0.000000e+00> : vector<128x128xf32>
    %23 = tpu.matmul %22, %3, %cst_14 {dimension_numbers = #tpu.dot_dimension_numbers<[1], [0], [0], [1], [0, 0, 1, 1], [], []>} : vector<128x128xf32>, vector<128x128xf32>, vector<128x128xf32> -> vector<128x128xf32>
    %24 = arith.addf %23, %9 : vector<128x128xf32>
    %25 = vector.broadcast %6 : vector<1x128xf32> to vector<128x128xf32>
    %26 = arith.addf %24, %25 : vector<128x128xf32>
    %c0_15 = arith.constant 0 : index
    %c0_16 = arith.constant 0 : index
    %27 = vector.load %arg3[%c0_15, %c0_16] : memref<128x128xf32, #tpu.memory_space<vmem>>, vector<128x128xf32>
    tpu.vector_store %arg3[%c0_15, %c0_16], %26 {strides = array<i32>} : memref<128x128xf32, #tpu.memory_space<vmem>>, vector<128x128xf32>,
    return
  }
  func.func @transform_0(%arg0: i32) -> (i32, i32) {
    %c0_i32 = arith.constant 0 : i32
    %c0_i32_0 = arith.constant 0 : i32
    return %arg0, %c0_i32 : i32, i32
  }
  func.func @transform_1(%arg0: i32) -> (i32, i32) {
    %c0_i32 = arith.constant 0 : i32
    %c0_i32_0 = arith.constant 0 : i32
    %c0_i32_1 = arith.constant 0 : i32
    return %c0_i32, %c0_i32_0 : i32, i32
  }
  func.func @transform_2(%arg0: i32) -> (i32, i32) {
    %c0_i32 = arith.constant 0 : i32
    %c0_i32_0 = arith.constant 0 : i32
    return %arg0, %c0_i32 : i32, i32
  }
}

</mosaic_0001>

<bundles_post_ra>
// kernel: storage_auth_forward.1
= control target key start
LH: loop header
LB: loop body
LE: loop exit
PB: predicated region body
PF: predicated region fallthrough
CT: control target
= control target key end

     0   :  { %s1282_s9 = smov 0   ;;  %s1625_s0 = inlined_call_operand.vmem [shape: f32[256,128], index: 0, kind: input, shape index: {}]   ;;  %s1626_s1 = inlined_call_operand.vmem [shape: f32[392,128], index: 1, kind: input, shape index: {}]   ;;  %s1627_s2 = inlined_call_operand.vmem [shape: f32[256,128], index: 2, kind: output, shape index: {}]  }
   0x1 LB: > { %s829_s10 = sadd.s32 4294967295, %s1265_s9   ;;  %p833_p0 = scmp.ge.s32.totalorder %s1265_s9, 1  ;;  %s1265_s9 = sphi %s1282_s9, %s12_s9  }
   0x2   : > { %p113_p1 = scmp.lt.s32.totalorder %s1265_s9, 3 }
   0x4   : > { %p114_p2 = pnand %p833_p0, %p113_p1 }
   0x5   : > { %v163_v0 = vld [vmem:[%s1626_s1] sm:$0xff] (!%p114_p2)  ;;  %v164_v1 = vld [vmem:[%s1626_s1 + $0x8] sm:$0xff] (!%p114_p2)  ;;  %v165_v2 = vld [vmem:[%s1626_s1 + $0x10] sm:$0xff] (!%p114_p2)  ;;  %s834_s17 = sshll.u32 (!%p114_p2), %s829_s10, 4 }
   0x6   : > { %117 = sbr.rel (%p114_p2) target bundleno = 722 (0x2d2), region = 28  ;;  %v1139_v3 = vpack.c.bf16 (!%p114_p2), %v164_v1, %v163_v0  ;;  %v166_v4 = vld [vmem:[%s1626_s1 + $0x18] sm:$0xff] (!%p114_p2)  ;;  %p136_p3 = scmp.lt.s32.totalorder (!%p114_p2), %s834_s17, 31  ;;  %v167_v6 = vld [vmem:[%s1626_s1 + $0x20] sm:$0xff] (!%p114_p2)  ;;  %v168_v7 = vld [vmem:[%s1626_s1 + $0x28] sm:$0xff] (!%p114_p2) }
   0x7   : > { %v1143_v5 = vpack.c.bf16 (!%p114_p2), %v166_v4, %v165_v2  ;;  %v1147_v8 = vpack.c.bf16 (!%p114_p2), %v168_v7, %v167_v6  ;;  %v169_v9 = vld [vmem:[%s1626_s1 + $0x30] sm:$0xff] (!%p114_p2)  ;;  %v179_v10 = vld [vmem:[%s1626_s1 + $0x80] sm:$0xff] (!%p114_p2)  ;;  %v180_v11 = vld [vmem:[%s1626_s1 + $0x88] sm:$0xff] (!%p114_p2) }
   0x8   : > { %1140 = vmatprep.subr.bf16.mxu0 (!%p114_p2), %v1139_v3  ;;  %v170_v12 = vld [vmem:[%s1626_s1 + $0x38] sm:$0xff] (!%p114_p2)  ;;  %v1171_v13 = vpack.c.bf16 (!%p114_p2), %v180_v11, %v179_v10  ;;  %v181_v14 = vld [vmem:[%s1626_s1 + $0x90] sm:$0xff] (!%p114_p2)  ;;  %v171_v19 = vld [vmem:[%s1626_s1 + $0x40] sm:$0xff] (!%p114_p2) }
   0x9   : > { %1142 = vmatpush3.bf16.msra.mxu0 (!%p114_p2), %v1139_v3  ;;  %v182_v15 = vld [vmem:[%s1626_s1 + $0x98] sm:$0xff] (!%p114_p2)  ;;  %v1151_v18 = vpack.c.bf16 (!%p114_p2), %v170_v12, %v169_v9  ;;  %v172_v20 = vld [vmem:[%s1626_s1 + $0x48] sm:$0xff] (!%p114_p2)  ;;  %v183_v21 = vld [vmem:[%s1626_s1 + $0xa0] sm:$0xff] (!%p114_p2) }
   0xa   : > { %1144 = vmatprep.subr.bf16.mxu0 (!%p114_p2), %v1143_v5  ;;  %v1175_v17 = vpack.c.bf16 (!%p114_p2), %v182_v15, %v181_v14  ;;  %1172 = vmatprep.subr.bf16.mxu1 (!%p114_p2), %v1171_v13  ;;  %v184_v22 = vld [vmem:[%s1626_s1 + $0xa8] sm:$0xff] (!%p114_p2)  ;;  %v185_v23 = vld [vmem:[%s1626_s1 + $0xb0] sm:$0xff] (!%p114_p2)  ;;  %v1155_v24 = vpack.c.bf16 (!%p114_p2), %v172_v20, %v171_v19  ;;  %v186_v26 = vld [vmem:[%s1626_s1 + $0xb8] sm:$0xff] (!%p114_p2) }
   0xb   : > { %1174 = vmatpush3.bf16.msra.mxu1 (!%p114_p2), %v1171_v13  ;;  %v1179_v25 = vpack.c.bf16 (!%p114_p2), %v184_v22, %v183_v21  ;;  %v173_v27 = vld [vmem:[%s1626_s1 + $0x50] sm:$0xff] (!%p114_p2)  ;;  %v174_v28 = vld [vmem:[%s1626_s1 + $0x58] sm:$0xff] (!%p114_p2)  ;;  %v1183_v29 = vpack.c.bf16 (!%p114_p2), %v186_v26, %v185_v23  ;;  %v187_v30 = vld [vmem:[%s1626_s1 + $0xc0] sm:$0xff] (!%p114_p2) }
   0xc   : > { %1176 = vmatprep.subr.bf16.mxu1 (!%p114_p2), %v1175_v17  ;;  %v188_v31 = vld [vmem:[%s1626_s1 + $0xc8] sm:$0xff] (!%p114_p2)  ;;  %v1159_v32 = vpack.c.bf16 (!%p114_p2), %v174_v28, %v173_v27  ;;  %v175_v33 = vld [vmem:[%s1626_s1 + $0x60] sm:$0xff] (!%p114_p2)  ;;  %v189_v36 = vld [vmem:[%s1626_s1 + $0xd0] sm:$0xff] (!%p114_p2) }
   0xd   : > { %s1629_s17 = smov (!%p136_p3, %s834_s17), 31  ;;  %1146 = vmatpush3.bf16.msra.mxu0 %v1143_v5  ;;  %v176_v34 = vld [vmem:[%s1626_s1 + $0x68] sm:$0xff]  ;;  %v1187_v35 = vpack.c.bf16 %v188_v31, %v187_v30  ;;  %v190_v37 = vld [vmem:[%s1626_s1 + $0xd8] sm:$0xff]  ;;  %v177_v39 = vld [vmem:[%s1626_s1 + $0x70] sm:$0xff] }
   0xe   : > { %s835_s26 = sshll.u32 %s1629_s17, 3  ;;  %1148 = vmatprep.subr.bf16.mxu0 %v1147_v8  ;;  %v1163_v38 = vpack.c.bf16 %v176_v34, %v175_v33  ;;  %v178_v40 = vld [vmem:[%s1626_s1 + $0x78] sm:$0xff]  ;;  %v1191_v41 = vpack.c.bf16 %v190_v37, %v189_v36  ;;  %v191_v58 = vld [vmem:[%s1626_s1 + $0xe0] sm:$0xff]  ;;  %v192_v59 = vld [vmem:[%s1626_s1 + $0xe8] sm:$0xff] }
   0xf   : > { %s1328_s7 = scalar_lea.vmem %s1625_s0, %s835_s26  ;;  %1178 = vmatpush3.bf16.msra.mxu1 %v1175_v17  ;;  %v1167_v42 = vpack.c.bf16 %v178_v40, %v177_v39  ;;  %v1195_v60 = vpack.c.bf16 %v192_v59, %v191_v58  ;;  %v193_v61 = vld [vmem:[%s1626_s1 + $0xf0] sm:$0xff]  ;;  %v194_v62 = vld [vmem:[%s1626_s1 + $0xf8] sm:$0xff]  ;;  %v195_v0 = vld [vmem:[%s1626_s1 + $0x100] sm:$0xff]  ;;  %s1573_s20 = scalar_lea.vmem %s1627_s2, %s835_s26 }
  0x10   : > { %v147_v16 = vld [vmem:[%s1328_s7] sm:$0xff]  ;;  %1180 = vmatprep.subr.bf16.mxu1 %v1179_v25  ;;  %v148_v43 = vld [vmem:[%s1328_s7 + $0x8] sm:$0xff]  ;;  %v149_v44 = vld [vmem:[%s1328_s7 + $0x10] sm:$0xff]  ;;  %v1199_v63 = vpack.c.bf16 %v194_v62, %v193_v61 }
  0x11   : > { %1003 = vmatprep.mubr.f32.mxu0 %v147_v16  ;;  %1150 = vmatpush3.bf16.msra.mxu0 %v1147_v8  ;;  %v150_v45 = vld [vmem:[%s1328_s7 + $0x18] sm:$0xff]  ;;  %v151_v46 = vld [vmem:[%s1328_s7 + $0x20] sm:$0xff]  ;;  %v152_v47 = vld [vmem:[%s1328_s7 + $0x28] sm:$0xff] }
  0x12   : > { %1152 = vmatprep.subr.bf16.mxu0 %v1151_v18  ;;  %v153_v48 = vld [vmem:[%s1328_s7 + $0x30] sm:$0xff]  ;;  %v154_v49 = vld [vmem:[%s1328_s7 + $0x38] sm:$0xff]  ;;  %v155_v50 = vld [vmem:[%s1328_s7 + $0x40] sm:$0xff] }
  0x13   : > { %1182 = vmatpush3.bf16.msra.mxu1 %v1179_v25  ;;  %v156_v51 = vld [vmem:[%s1328_s7 + $0x48] sm:$0xff]  ;;  %v157_v52 = vld [vmem:[%s1328_s7 + $0x50] sm:$0xff]  ;;  %v158_v53 = vld [vmem:[%s1328_s7 + $0x58] sm:$0xff] }
  0x14   : > { %1184 = vmatprep.subr.bf16.mxu1 %v1183_v29  ;;  %v159_v54 = vld [vmem:[%s1328_s7 + $0x60] sm:$0xff]  ;;  %v160_v55 = vld [vmem:[%s1328_s7 + $0x68] sm:$0xff]  ;;  %v161_v56 = vld [vmem:[%s1328_s7 + $0x70] sm:$0xff] }
  0x15   : > { %1154 = vmatpush3.bf16.msra.mxu0 %v1151_v18  ;;  %v162_v57 = vld [vmem:[%s1328_s7 + $0x78] sm:$0xff]  ;;  %v196_v1 = vld [vmem:[%s1626_s1 + $0x108] sm:$0xff]  ;;  %v197_v2 = vld [vmem:[%s1626_s1 + $0x110] sm:$0xff] }
  0x16   : > { %1156 = vmatprep.subr.bf16.mxu0 %v1155_v24  ;;  %v1203_v3 = vpack.c.bf16 %v196_v1, %v195_v0  ;;  %v198_v4 = vld [vmem:[%s1626_s1 + $0x118] sm:$0xff]  ;;  %v199_v6 = vld [vmem:[%s1626_s1 + $0x120] sm:$0xff]  ;;  %v200_v7 = vld [vmem:[%s1626_s1 + $0x128] sm:$0xff] }
  0x17   : > { %1186 = vmatpush3.bf16.msra.mxu1 %v1183_v29  ;;  %v1207_v5 = vpack.c.bf16 %v198_v4, %v197_v2  ;;  %v1430_v8 = vpack.c.bf16 %v200_v7, %v199_v6  ;;  %v201_v9 = vld [vmem:[%s1626_s1 + $0x130] sm:$0xff]  ;;  %v202_v10 = vld [vmem:[%s1626_s1 + $0x138] sm:$0xff]  ;;  %v203_v12 = vld [vmem:[%s1626_s1 + $0x140] sm:$0xff] }
  0x18   : > { %1188 = vmatprep.subr.bf16.mxu1 %v1187_v35  ;;  %v1439_v11 = vpack.c.bf16 %v202_v10, %v201_v9  ;;  %v204_v13 = vld [vmem:[%s1626_s1 + $0x148] sm:$0xff]  ;;  %v205_v15 = vld [vmem:[%s1626_s1 + $0x150] sm:$0xff]  ;;  %v206_v16 = vld [vmem:[%s1626_s1 + $0x158] sm:$0xff] }
  0x19   : > { %1158 = vmatpush3.bf16.msra.mxu0 %v1155_v24  ;;  %v1449_v14 = vpack.c.bf16 %v204_v13, %v203_v12  ;;  %v1459_v17 = vpack.c.bf16 %v206_v16, %v205_v15  ;;  %v207_v18 = vld [vmem:[%s1626_s1 + $0x160] sm:$0xff]  ;;  %v208_v19 = vld [vmem:[%s1626_s1 + $0x168] sm:$0xff]  ;;  %v209_v6 = vld [vmem:[%s1626_s1 + $0x170] sm:$0xff] }
  0x1a   : > { %1160 = vmatprep.subr.bf16.mxu0 %v1159_v32  ;;  %v1469_v20 = vpack.c.bf16 %v208_v19, %v207_v18  ;;  %v1477_v21 = vld [vmem:[%s1626_s1 + $0x180] ss:$0 sm:$0xff]  ;;  %v210_v7 = vld [vmem:[%s1626_s1 + $0x178] sm:$0xff]  ;;  %v839_v9 = vld [vmem:[%s1626_s1 + $0x181] ss:$0 sm:$0xff] }
  0x1b   : > { %1190 = vmatpush3.bf16.msra.mxu1 %v1187_v35 }
  0x1c   : > { %1192 = vmatprep.subr.bf16.mxu1 %v1191_v41 }
  0x1d   : > { %1162 = vmatpush3.bf16.msra.mxu0 %v1159_v32 }
  0x1e   : > { %1164 = vmatprep.subr.bf16.mxu0 %v1163_v38 }
  0x1f   : > { %1194 = vmatpush3.bf16.msra.mxu1 %v1191_v41 }
  0x20   : > { %1196 = vmatprep.subr.bf16.mxu1 %v1195_v60 }
  0x21   : > { %1166 = vmatpush3.bf16.msra.mxu0 %v1163_v38 }
  0x22   : > { %1168 = vmatprep.subr.bf16.mxu0 %v1167_v42 }
  0x23   : > { %1198 = vmatpush3.bf16.msra.mxu1 %v1195_v60 }
  0x24   : > { %1200 = vmatprep.subr.bf16.mxu1 %v1199_v63 }
  0x25   : > { %1170 = vmatpush3.bf16.msra.mxu0 %v1167_v42 }
  0x26   : > { %1204 = vmatprep.subr.bf16.mxu0 %v1203_v3 }
  0x27   : > { %1202 = vmatpush3.bf16.msra.mxu1 %v1199_v63 }
  0x28   : > { %1004 = vmatmul.mubr.f32.vlgmr.msra.gmra.mrb[0].mxu0 %v148_v43  ;;  %1235 = vmatprep.subr.bf16.mxu1 %v1203_v3 }
  0x29   : > { %1006 = vmatprep.mubr.f32.mxu0 %v149_v44  ;;  %1206 = vmatpush3.bf16.msra.mxu0 %v1203_v3 }
  0x2a   : > { %1208 = vmatprep.subr.bf16.mxu0 %v1207_v5 }
  0x2c   : > { %1007 = vmatmul.mubr.f32.gmra.mrb[2].mxu0 %v150_v45 }
  0x2d   : > { %1009 = vmatprep.mubr.f32.mxu0 %v151_v46  ;;  %1210 = vmatpush3.bf16.msra.mxu0 %v1207_v5 }
  0x2e   : > { %1212 = vmatprep.subr.bf16.mxu0 %v1430_v8 }
  0x30   : > { %1010 = vmatmul.mubr.f32.gmra.mrb[4].mxu0 %v152_v47 }
  0x31   : > { %1012 = vmatprep.mubr.f32.mxu0 %v153_v48  ;;  %1214 = vmatpush3.bf16.msra.mxu0 %v1430_v8 }
  0x32   : > { %1216 = vmatprep.subr.bf16.mxu0 %v1439_v11 }
  0x34   : > { %1013 = vmatmul.mubr.f32.gmra.mrb[6].mxu0 %v154_v49 }
  0x35   : > { %1015 = vmatprep.mubr.f32.mxu0 %v155_v50  ;;  %1218 = vmatpush3.bf16.msra.mxu0 %v1439_v11 }
  0x36   : > { %1220 = vmatprep.subr.bf16.mxu0 %v1449_v14 }
  0x38   : > { %1016 = vmatmul.mubr.f32.gmra.mrb[8].mxu0 %v156_v51 }
  0x39   : > { %1018 = vmatprep.mubr.f32.mxu0 %v157_v52  ;;  %1222 = vmatpush3.bf16.msra.mxu0 %v1449_v14 }
  0x3a   : > { %1224 = vmatprep.subr.bf16.mxu0 %v1459_v17 }
  0x3c   : > { %1019 = vmatmul.mubr.f32.gmra.mrb[10].mxu0 %v158_v53 }
  0x3d   : > { %1021 = vmatprep.mubr.f32.mxu0 %v159_v54  ;;  %1226 = vmatpush3.bf16.msra.mxu0 %v1459_v17 }
  0x3e   : > { %1228 = vmatprep.subr.bf16.mxu0 %v1469_v20 }
  0x40   : > { %1022 = vmatmul.mubr.f32.gmra.mrb[12].mxu0 %v160_v55 }
  0x41   : > { %1024 = vmatprep.mubr.f32.mxu0 %v161_v56  ;;  %1230 = vmatpush3.bf16.msra.mxu0 %v1469_v20 }
  0x44   : > { %1025 = vmatmul.mubr.f32.gmra.mrb[14].mxu0 %v162_v57 }
  0xfb   : > { %v1005_v22 = vpop.f32.mrb[0].mxu0 }
  0xfc   : > { %v1480_v23 = vadd.f32 %v1005_v22, %v1477_v21  ;;  %v284_v24 = vpop.f32.mrb[1].mxu0 }
  0xfd   : > { %v1483_v25 = vadd.f32 %v1477_v21, %v284_v24 }
  0xfe   : > { %v364_v26 = vmax.f32 %v1480_v23, 0.0 }
  0xff   : > { %v1008_v27 = vpop.f32.mrb[2].mxu0  ;;  %v363_v28 = vmax.f32 %v1483_v25, 0.0 }
 0x100   : > { %v1488_v29 = vadd.f32 %v1008_v27, %v1477_v21  ;;  %v294_v30 = vpop.f32.mrb[3].mxu0  ;;  %vm380_vm1 = vcmp.lt.f32.partialorder %v364_v26, 1.0001 }
 0x101   : > { %v1491_v31 = vadd.f32 %v1477_v21, %v294_v30  ;;  %vm379_vm0 = vcmp.lt.f32.partialorder %v363_v28, 1.0001 }
 0x102   : > { %v366_v32 = vmax.f32 %v1488_v29, 0.0  ;;  %1059 = vmatprep.mubr.msk.f32.mxu1 %vm379_vm0, %v363_v28 }
 0x103   : > { %v365_v33 = vmax.f32 %v1491_v31, 0.0  ;;  %v1011_v34 = vpop.f32.mrb[4].mxu0  ;;  %1060 = vmatmul.mubr.msk.f32.vlgmr.msra.gmra.mrb[0].mxu1 %vm380_vm1, %v364_v26 }
 0x104   : > { %v1496_v35 = vadd.f32 %v1011_v34, %v1477_v21  ;;  %v304_v36 = vpop.f32.mrb[5].mxu0  ;;  %1243 = vmatpush3.bf16.msra.mxu1 %v1203_v3  ;;  %vm382_vm3 = vcmp.lt.f32.partialorder %v366_v32, 1.0001 }
 0x105   : > { %v1499_v37 = vadd.f32 %v1477_v21, %v304_v36  ;;  %vm381_vm2 = vcmp.lt.f32.partialorder %v365_v33, 1.0001  ;;  %1236 = vmatprep.subr.bf16.mxu1 %v1207_v5 }
 0x106   : > { %v368_v38 = vmax.f32 %v1496_v35, 0.0  ;;  %1062 = vmatprep.mubr.msk.f32.mxu1 %vm381_vm2, %v365_v33 }
 0x107   : > { %v367_v39 = vmax.f32 %v1499_v37, 0.0  ;;  %v1014_v40 = vpop.f32.mrb[6].mxu0  ;;  %1063 = vmatmul.mubr.msk.f32.gmra.mrb[2].mxu1 %vm382_vm3, %v366_v32 }
 0x108   : > { %v1504_v41 = vadd.f32 %v1014_v40, %v1477_v21  ;;  %v314_v42 = vpop.f32.mrb[7].mxu0  ;;  %1244 = vmatpush3.bf16.msra.mxu1 %v1207_v5  ;;  %vm384_vm5 = vcmp.lt.f32.partialorder %v368_v38, 1.0001 }
 0x109   : > { %v1507_v43 = vadd.f32 %v1477_v21, %v314_v42  ;;  %vm383_vm4 = vcmp.lt.f32.partialorder %v367_v39, 1.0001  ;;  %1237 = vmatprep.subr.bf16.mxu1 %v1430_v8 }
 0x10a   : > { %v370_v44 = vmax.f32 %v1504_v41, 0.0  ;;  %1065 = vmatprep.mubr.msk.f32.mxu1 %vm383_vm4, %v367_v39 }
 0x10b   : > { %v369_v45 = vmax.f32 %v1507_v43, 0.0  ;;  %v1017_v46 = vpop.f32.mrb[8].mxu0  ;;  %1066 = vmatmul.mubr.msk.f32.gmra.mrb[4].mxu1 %vm384_vm5, %v368_v38 }
 0x10c   : > { %v1513_v47 = vadd.f32 %v1017_v46, %v1477_v21  ;;  %v324_v48 = vpop.f32.mrb[9].mxu0  ;;  %1245 = vmatpush3.bf16.msra.mxu1 %v1430_v8  ;;  %vm386_vm7 = vcmp.lt.f32.partialorder %v370_v44, 1.0001  ;;  %v1231_v8 = vpack.c.bf16 %v210_v7, %v209_v6 }
 0x10d   : > { %v1517_v49 = vadd.f32 %v1477_v21, %v324_v48  ;;  %vm385_vm6 = vcmp.lt.f32.partialorder %v369_v45, 1.0001  ;;  %1238 = vmatprep.subr.bf16.mxu1 %v1439_v11 }
 0x10e   : > { %v372_v50 = vmax.f32 %v1513_v47, 0.0  ;;  %1068 = vmatprep.mubr.msk.f32.mxu1 %vm385_vm6, %v369_v45  ;;  %1232 = vmatprep.subr.bf16.mxu0 %v1231_v8 }
 0x10f   : > { %v371_v51 = vmax.f32 %v1517_v49, 0.0  ;;  %v1020_v52 = vpop.f32.mrb[10].mxu0  ;;  %1069 = vmatmul.mubr.msk.f32.gmra.mrb[6].mxu1 %vm386_vm7, %v370_v44  ;;  %1234 = vmatpush3.bf16.msra.mxu0 %v1231_v8 }
 0x110   : > { %v1523_v53 = vadd.f32 %v1020_v52, %v1477_v21  ;;  %v334_v54 = vpop.f32.mrb[11].mxu0  ;;  %1246 = vmatpush3.bf16.msra.mxu1 %v1439_v11  ;;  %vm388_vm9 = vcmp.lt.f32.partialorder %v372_v50, 1.0001  ;;  %v1565_v52 = vld [vmem:[%s1626_s1 + $0x182] ss:$0 sm:$0xff] }
 0x111   : > { %v1527_v55 = vadd.f32 %v1477_v21, %v334_v54  ;;  %vm387_vm8 = vcmp.lt.f32.partialorder %v371_v51, 1.0001  ;;  %1239 = vmatprep.subr.bf16.mxu1 %v1449_v14 }
 0x112   : > { %v374_v56 = vmax.f32 %v1523_v53, 0.0  ;;  %1071 = vmatprep.mubr.msk.f32.mxu1 %vm387_vm8, %v371_v51 }
 0x113   : > { %v373_v57 = vmax.f32 %v1527_v55, 0.0  ;;  %v1023_v58 = vpop.f32.mrb[12].mxu0  ;;  %1072 = vmatmul.mubr.msk.f32.gmra.mrb[8].mxu1 %vm388_vm9, %v372_v50 }
 0x114   : > { %v1533_v59 = vadd.f32 %v1023_v58, %v1477_v21  ;;  %v344_v60 = vpop.f32.mrb[13].mxu0  ;;  %1247 = vmatpush3.bf16.msra.mxu1 %v1449_v14  ;;  %vm390_vm11 = vcmp.lt.f32.partialorder %v374_v56, 1.0001 }
 0x115   : > { %v1537_v61 = vadd.f32 %v1477_v21, %v344_v60  ;;  %vm389_vm10 = vcmp.lt.f32.partialorder %v373_v57, 1.0001  ;;  %1240 = vmatprep.subr.bf16.mxu1 %v1459_v17 }
 0x116   : > { %v376_v62 = vmax.f32 %v1533_v59, 0.0  ;;  %1074 = vmatprep.mubr.msk.f32.mxu1 %vm389_vm10, %v373_v57 }
 0x117   : > { %v375_v63 = vmax.f32 %v1537_v61, 0.0  ;;  %v1026_v0 = vpop.f32.mrb[14].mxu0  ;;  %1075 = vmatmul.mubr.msk.f32.gmra.mrb[10].mxu1 %vm390_vm11, %v374_v56 }
 0x118   : > { %v1543_v1 = vadd.f32 %v1026_v0, %v1477_v21  ;;  %v354_v2 = vpop.f32.mrb[15].mxu0  ;;  %1248 = vmatpush3.bf16.msra.mxu1 %v1459_v17  ;;  %vm392_vm13 = vcmp.lt.f32.partialorder %v376_v62, 1.0001 }
 0x119   : > { %v1547_v3 = vadd.f32 %v1477_v21, %v354_v2  ;;  %vm391_vm12 = vcmp.lt.f32.partialorder %v375_v63, 1.0001  ;;  %1241 = vmatprep.subr.bf16.mxu1 %v1469_v20 }
 0x11a   : > { %v378_v4 = vmax.f32 %v1543_v1, 0.0  ;;  %1077 = vmatprep.mubr.msk.f32.mxu1 %vm391_vm12, %v375_v63 }
 0x11b   : > { %v377_v5 = vmax.f32 %v1547_v3, 0.0  ;;  %1078 = vmatmul.mubr.msk.f32.gmra.mrb[12].mxu1 %vm392_vm13, %v376_v62 }
 0x11c   : > { %1249 = vmatpush3.bf16.msra.mxu1 %v1469_v20  ;;  %vm394_vm15 = vcmp.lt.f32.partialorder %v378_v4, 1.0001 }
 0x11d   : > { %vm393_vm14 = vcmp.lt.f32.partialorder %v377_v5, 1.0001  ;;  %1242 = vmatprep.subr.bf16.mxu1 %v1231_v8 }
 0x11e   : > { %1080 = vmatprep.mubr.msk.f32.mxu1 %vm393_vm14, %v377_v5 }
 0x11f   : > { %1081 = vmatmul.mubr.msk.f32.gmra.mrb[14].mxu1 %vm394_vm15, %v378_v4 }
 0x120   : > { %1250 = vmatpush3.bf16.msra.mxu1 %v1231_v8 }
 0x1d6   : > { %v1061_v10 = vpop.f32.mrb[0].mxu1 }
 0x1d7   : > { %v487_v11 = vadd.f32 %v1061_v10, %v839_v9  ;;  %v481_v12 = vpop.f32.mrb[1].mxu1 }
 0x1d8   : > { %v482_v13 = vadd.f32 %v839_v9, %v481_v12 }
 0x1d9   : > { %vm561_vm1 = vcmp.gt.f32.partialorder %v487_v11, 40.0 }
 0x1da   : > { %vm560_vm0 = vcmp.gt.f32.partialorder %v482_v13, 40.0  ;;  %v1064_v14 = vpop.f32.mrb[2].mxu1 }
 0x1db   : > { %v497_v15 = vadd.f32 %v1064_v14, %v839_v9  ;;  %v491_v16 = vpop.f32.mrb[3].mxu1  ;;  %1115 = vmatprep.mubr.msk.f32.mxu0 %vm560_vm0, %v482_v13 }
 0x1dc   : > { %v492_v17 = vadd.f32 %v839_v9, %v491_v16  ;;  %1116 = vmatmul.mubr.msk.f32.vlgmr.msra.gmra.mrb[16].mxu0 %vm561_vm1, %v487_v11 }
 0x1dd   : > { %vm563_vm3 = vcmp.gt.f32.partialorder %v497_v15, 40.0 }
 0x1de   : > { %vm562_vm2 = vcmp.gt.f32.partialorder %v492_v17, 40.0  ;;  %v1067_v18 = vpop.f32.mrb[4].mxu1 }
 0x1df   : > { %v507_v19 = vadd.f32 %v1067_v18, %v839_v9  ;;  %v501_v20 = vpop.f32.mrb[5].mxu1  ;;  %1118 = vmatprep.mubr.msk.f32.mxu0 %vm562_vm2, %v492_v17 }
 0x1e0   : > { %v502_v21 = vadd.f32 %v839_v9, %v501_v20  ;;  %1119 = vmatmul.mubr.msk.f32.gmra.mrb[18].mxu0 %vm563_vm3, %v497_v15 }
 0x1e1   : > { %vm565_vm5 = vcmp.gt.f32.partialorder %v507_v19, 40.0 }
 0x1e2   : > { %vm564_vm4 = vcmp.gt.f32.partialorder %v502_v21, 40.0  ;;  %v1070_v22 = vpop.f32.mrb[6].mxu1 }
 0x1e3   : > { %v517_v24 = vadd.f32 %v1070_v22, %v839_v9  ;;  %v511_v26 = vpop.f32.mrb[7].mxu1  ;;  %1121 = vmatprep.mubr.msk.f32.mxu0 %vm564_vm4, %v502_v21 }
 0x1e4   : > { %v512_v27 = vadd.f32 %v839_v9, %v511_v26  ;;  %1122 = vmatmul.mubr.msk.f32.gmra.mrb[20].mxu0 %vm565_vm5, %v507_v19 }
 0x1e5   : > { %vm567_vm7 = vcmp.gt.f32.partialorder %v517_v24, 40.0 }
 0x1e6   : > { %vm566_vm6 = vcmp.gt.f32.partialorder %v512_v27, 40.0  ;;  %v1073_v28 = vpop.f32.mrb[8].mxu1 }
 0x1e7   : > { %v527_v30 = vadd.f32 %v1073_v28, %v839_v9  ;;  %v521_v32 = vpop.f32.mrb[9].mxu1  ;;  %1124 = vmatprep.mubr.msk.f32.mxu0 %vm566_vm6, %v512_v27 }
 0x1e8   : > { %v522_v33 = vadd.f32 %v839_v9, %v521_v32  ;;  %1125 = vmatmul.mubr.msk.f32.gmra.mrb[22].mxu0 %vm567_vm7, %v517_v24 }
 0x1e9   : > { %vm569_vm9 = vcmp.gt.f32.partialorder %v527_v30, 40.0 }
 0x1ea   : > { %vm568_vm8 = vcmp.gt.f32.partialorder %v522_v33, 40.0  ;;  %v1076_v34 = vpop.f32.mrb[10].mxu1 }
 0x1eb   : > { %v537_v36 = vadd.f32 %v1076_v34, %v839_v9  ;;  %v531_v38 = vpop.f32.mrb[11].mxu1  ;;  %1127 = vmatprep.mubr.msk.f32.mxu1 %vm568_vm8, %v522_v33 }
 0x1ec   : > { %v532_v39 = vadd.f32 %v839_v9, %v531_v38  ;;  %1128 = vmatmul.mubr.msk.f32.vlgmr.msra.gmra.mrb[16].mxu1 %vm569_vm9, %v527_v30 }
 0x1ed   : > { %vm571_vm11 = vcmp.gt.f32.partialorder %v537_v36, 40.0 }
 0x1ee   : > { %vm570_vm10 = vcmp.gt.f32.partialorder %v532_v39, 40.0  ;;  %v1079_v40 = vpop.f32.mrb[12].mxu1 }
 0x1ef   : > { %v547_v42 = vadd.f32 %v1079_v40, %v839_v9  ;;  %v541_v44 = vpop.f32.mrb[13].mxu1  ;;  %1130 = vmatprep.mubr.msk.f32.mxu1 %vm570_vm10, %v532_v39 }
 0x1f0   : > { %v542_v45 = vadd.f32 %v839_v9, %v541_v44  ;;  %1131 = vmatmul.mubr.msk.f32.gmra.mrb[18].mxu1 %vm571_vm11, %v537_v36 }
 0x1f1   : > { %vm573_vm13 = vcmp.gt.f32.partialorder %v547_v42, 40.0 }
 0x1f2   : > { %vm572_vm12 = vcmp.gt.f32.partialorder %v542_v45, 40.0  ;;  %v1082_v46 = vpop.f32.mrb[14].mxu1 }
 0x1f3   : > { %v557_v48 = vadd.f32 %v1082_v46, %v839_v9  ;;  %v551_v50 = vpop.f32.mrb[15].mxu1  ;;  %1133 = vmatprep.mubr.msk.f32.mxu1 %vm572_vm12, %v542_v45 }
 0x1f4   : > { %v552_v51 = vadd.f32 %v839_v9, %v551_v50  ;;  %1134 = vmatmul.mubr.msk.f32.gmra.mrb[20].mxu1 %vm573_vm13, %v547_v42 }
 0x1f5   : > { %vm575_vm15 = vcmp.gt.f32.partialorder %v557_v48, 40.0 }
 0x1f6   : > { %vm574_vm14 = vcmp.gt.f32.partialorder %v552_v51, 40.0 }
 0x1f7   : > { %1136 = vmatprep.mubr.msk.f32.mxu1 %vm574_vm14, %v552_v51 }
 0x1f8   : > { %1137 = vmatmul.mubr.msk.f32.gmra.mrb[22].mxu1 %vm575_vm15, %v557_v48 }
 0x2af   : > { %v1117_v54 = vpop.f32.mrb[16].mxu0 }
 0x2b0   : > { %v664_v56 = vadd.f32 %v1117_v54, %v1480_v23  ;;  %v658_v57 = vpop.f32.mrb[17].mxu0 }
 0x2b1   : > { %v659_v58 = vadd.f32 %v658_v57, %v1483_v25 }
 0x2b2   : > { %v742_v60 = vadd.f32 %v1565_v52, %v664_v56 }
 0x2b3   : > { %v741_v62 = vadd.f32 %v1565_v52, %v659_v58  ;;  %v1120_v63 = vpop.f32.mrb[18].mxu0 }
 0x2b4   : > { %758 = vst [vmem:[%s1573_s20 + $0x8] sm:$0xff] %v742_v60  ;;  %v674_v23 = vadd.f32 %v1120_v63, %v1488_v29  ;;  %v668_v0 = vpop.f32.mrb[19].mxu0 }
 0x2b5   : > { %757 = vst [vmem:[%s1573_s20] sm:$0xff] %v741_v62  ;;  %v669_v2 = vadd.f32 %v668_v0, %v1491_v31 }
 0x2b6   : > { %v744_v4 = vadd.f32 %v1565_v52, %v674_v23 }
 0x2b7   : > { %v743_v5 = vadd.f32 %v1565_v52, %v669_v2  ;;  %v1123_v6 = vpop.f32.mrb[20].mxu0 }
 0x2b8   : > { %760 = vst [vmem:[%s1573_s20 + $0x18] sm:$0xff] %v744_v4  ;;  %v684_v25 = vadd.f32 %v1123_v6, %v1496_v35  ;;  %v678_v7 = vpop.f32.mrb[21].mxu0 }
 0x2b9   : > { %759 = vst [vmem:[%s1573_s20 + $0x10] sm:$0xff] %v743_v5  ;;  %v679_v8 = vadd.f32 %v678_v7, %v1499_v37 }
 0x2ba   : > { %v746_v29 = vadd.f32 %v1565_v52, %v684_v25 }
 0x2bb   : > { %v745_v9 = vadd.f32 %v1565_v52, %v679_v8  ;;  %v1126_v10 = vpop.f32.mrb[22].mxu0 }
 0x2bc   : > { %762 = vst [vmem:[%s1573_s20 + $0x28] sm:$0xff] %v746_v29  ;;  %v694_v31 = vadd.f32 %v1126_v10, %v1504_v41  ;;  %v688_v11 = vpop.f32.mrb[23].mxu0 }
 0x2bd   : > { %761 = vst [vmem:[%s1573_s20 + $0x20] sm:$0xff] %v745_v9  ;;  %v689_v12 = vadd.f32 %v688_v11, %v1507_v43 }
 0x2be   : > { %v748_v35 = vadd.f32 %v1565_v52, %v694_v31 }
 0x2bf   : > { %v747_v13 = vadd.f32 %v1565_v52, %v689_v12  ;;  %v1129_v14 = vpop.f32.mrb[16].mxu1 }
 0x2c0   : > { %764 = vst [vmem:[%s1573_s20 + $0x38] sm:$0xff] %v748_v35  ;;  %v704_v37 = vadd.f32 %v1129_v14, %v1513_v47  ;;  %v698_v15 = vpop.f32.mrb[17].mxu1 }
 0x2c1   : > { %763 = vst [vmem:[%s1573_s20 + $0x30] sm:$0xff] %v747_v13  ;;  %v699_v16 = vadd.f32 %v698_v15, %v1517_v49 }
 0x2c2   : > { %v750_v41 = vadd.f32 %v1565_v52, %v704_v37 }
 0x2c3   : > { %v749_v17 = vadd.f32 %v1565_v52, %v699_v16  ;;  %v1132_v18 = vpop.f32.mrb[18].mxu1 }
 0x2c4   : > { %766 = vst [vmem:[%s1573_s20 + $0x48] sm:$0xff] %v750_v41  ;;  %v714_v43 = vadd.f32 %v1132_v18, %v1523_v53  ;;  %v708_v19 = vpop.f32.mrb[19].mxu1 }
 0x2c5   : > { %765 = vst [vmem:[%s1573_s20 + $0x40] sm:$0xff] %v749_v17  ;;  %v709_v20 = vadd.f32 %v708_v19, %v1527_v55 }
 0x2c6   : > { %v752_v47 = vadd.f32 %v1565_v52, %v714_v43 }
 0x2c7   : > { %v751_v21 = vadd.f32 %v1565_v52, %v709_v20  ;;  %v1135_v22 = vpop.f32.mrb[20].mxu1 }
 0x2c8   : > { %768 = vst [vmem:[%s1573_s20 + $0x58] sm:$0xff] %v752_v47  ;;  %v724_v49 = vadd.f32 %v1135_v22, %v1533_v59  ;;  %v718_v24 = vpop.f32.mrb[21].mxu1 }
 0x2c9   : > { %767 = vst [vmem:[%s1573_s20 + $0x50] sm:$0xff] %v751_v21  ;;  %v719_v26 = vadd.f32 %v718_v24, %v1537_v61 }
 0x2ca   : > { %v754_v53 = vadd.f32 %v1565_v52, %v724_v49 }
 0x2cb   : > { %v753_v27 = vadd.f32 %v1565_v52, %v719_v26  ;;  %v1138_v28 = vpop.f32.mrb[22].mxu1 }
 0x2cc   : > { %770 = vst [vmem:[%s1573_s20 + $0x68] sm:$0xff] %v754_v53  ;;  %v734_v55 = vadd.f32 %v1138_v28, %v1543_v1  ;;  %v728_v30 = vpop.f32.mrb[23].mxu1 }
 0x2cd   : > { %769 = vst [vmem:[%s1573_s20 + $0x60] sm:$0xff] %v753_v27  ;;  %v729_v32 = vadd.f32 %v728_v30, %v1547_v3 }
 0x2ce   : > { %v756_v33 = vadd.f32 %v1565_v52, %v734_v55 }
 0x2cf   : > { %v755_v59 = vadd.f32 %v1565_v52, %v729_v32 }
 0x2d0   : > { %772 = vst [vmem:[%s1573_s20 + $0x78] sm:$0xff] %v756_v33 }
 0x2d1   : > { %771 = vst [vmem:[%s1573_s20 + $0x70] sm:$0xff] %v755_v59 }
 0x2d2 PF: > { %s12_s9 = sadd.s32 1, %s1265_s9  }
 0x2d3   : > { %p9_p4 = scmp.ge.s32.totalorder %s12_s9, 4  }
 0x2d5   :  { %11 = sbr.rel (!%p9_p4) target bundleno = 1 (0x1), region = 58 }

</bundles_post_ra>
